<compile_context>
chip_gen: v5e
topology: v5e:2x2
jax: 0.10.0
libtpu: 0.0.40
codegen_flags: <defaults>
</compile_context>

<pallas_src>
import math

import jax
import jax.numpy as jnp
from jax.experimental import pallas as pl
from jax.experimental.pallas import tpu as pltpu

# ----------------------------- hyper-parameters ------------------------------
BATCH = 8
HIDDEN = 32            # hidden_size (== input_size, required by init_hidden)
INPUT = HIDDEN
NUM_LAYERS = 2
BAR = 4

# --------------------- packed weight-slab layout (rows, 128) -----------------
# 4*HIDDEN == BAR*HIDDEN == 128, so every sub-tensor is exactly 128 lanes wide
# and every row offset below is a multiple of 8 (sublane aligned).
_R_WIH0 = (0 * HIDDEN, 1 * HIDDEN)                      # Wih_l0^T   (32,128)
_R_WHH0 = (1 * HIDDEN, 2 * HIDDEN)                      # Whh_l0^T   (32,128)
_R_WIH1 = (2 * HIDDEN, 3 * HIDDEN)                      # Wih_l1^T   (32,128)
_R_WHH1 = (3 * HIDDEN, 4 * HIDDEN)                      # Whh_l1^T   (32,128)
_R_WLIN = (4 * HIDDEN, 4 * HIDDEN + BAR * HIDDEN)       # blkdiag W^T(128,128)
_R_B0 = (_R_WLIN[1], _R_WLIN[1] + BATCH)                # l0 bias    (B,128)
_R_B1 = (_R_B0[1], _R_B0[1] + BATCH)                    # l1 bias    (B,128)
_R_BLIN = (_R_B1[1], _R_B1[1] + BATCH)                  # lin bias   (B,128)
_SLAB_ROWS = _R_BLIN[1]                                 # 280

_VMEM = pl.BlockSpec(memory_space=pltpu.MemorySpace.VMEM)


# ------------------------------- Pallas kernel --------------------------------
def _conductor_kernel(z_ref, slab_ref, out_ref, feat_ref):
    """Entire Conductor forward: 2-layer LSTM x BAR steps + final Linear."""
    H = HIDDEN
    z = z_ref[...]                                       # (B, H)

    # Static sub-views of the single packed weight slab (one DMA for all
    # parameters; biases already broadcast to BATCH rows at pack time).
    wih0 = slab_ref[_R_WIH0[0]:_R_WIH0[1], :]            # (H, 4H)
    whh0 = slab_ref[_R_WHH0[0]:_R_WHH0[1], :]            # (H, 4H)
    wih1 = slab_ref[_R_WIH1[0]:_R_WIH1[1], :]            # (H, 4H)
    whh1 = slab_ref[_R_WHH1[0]:_R_WHH1[1], :]            # (H, 4H)
    wlin = slab_ref[_R_WLIN[0]:_R_WLIN[1], :]            # (BAR*H, BAR*H)
    b0 = slab_ref[_R_B0[0]:_R_B0[1], :]                  # (B, 4H)
    b1 = slab_ref[_R_B1[0]:_R_B1[1], :]                  # (B, 4H)
    blin = slab_ref[_R_BLIN[0]:_R_BLIN[1], :]            # (B, BAR*H)

    # init_hidden: h = c = z for both layers.
    h0 = z
    c0 = z
    h1 = z
    c1 = z

    # Hoisted: layer-0 input is the constant z at every bar step.
    gx0 = jnp.dot(z, wih0, preferred_element_type=jnp.float32) + b0   # (B,4H)

    def cell(gates, c):
        # Activate the full (B, 4H) vreg once per nonlinearity (2 EUP pushes),
        # then slice i/f/g/o (PyTorch gate order) out of the results.
        sig = jax.nn.sigmoid(gates)
        th = jnp.tanh(gates)
        i = sig[:, 0:H]
        f = sig[:, H:2 * H]
        g = th[:, 2 * H:3 * H]
        o = sig[:, 3 * H:4 * H]
        c_new = f * c + i * g
        return o * jnp.tanh(c_new), c_new

    for t in range(BAR):                                 # static unroll
        # Layer-1 recurrent push depends only on the PREVIOUS step's h1, so
        # issue it first: the MXU work overlaps layer-0's cell EUP/VPU work.
        hh1 = jnp.dot(h1, whh1, preferred_element_type=jnp.float32)
        # Layer 0: only the recurrent matmul remains in the loop.
        g0 = gx0 + jnp.dot(h0, whh0, preferred_element_type=jnp.float32)
        h0, c0 = cell(g0, c0)
        # Layer 1: split ih/hh matmuls (no lane concat on the serial path).
        g1 = jnp.dot(h0, wih1, preferred_element_type=jnp.float32) + hh1 + b1
        h1, c1 = cell(g1, c1)
        # Stream this bar slot into scratch with a static slice (overlaps
        # with later iterations instead of a tail concat).
        feat_ref[:, t * H:(t + 1) * H] = h1

    feat = feat_ref[...]                                 # (B, BAR*H), lane-dense
    # Final Linear applied to every bar slot via a block-diagonal weight:
    # one (B, BAR*H) @ (BAR*H, BAR*H) MXU push, single unmasked 128-lane store.
    out_ref[...] = (jnp.dot(feat, wlin, preferred_element_type=jnp.float32)
                    + blin)


# ------------------------------ parameter helpers -----------------------------
def _uniform(key, shape, fan_in):
    bound = 1.0 / math.sqrt(fan_in)
    return jax.random.uniform(key, shape, jnp.float32,
                              minval=-bound, maxval=bound)


def make_torch_params(key):
    """Parameters in PyTorch layout (nn.LSTM / nn.Linear defaults)."""
    ks = iter(jax.random.split(key, 16))
    nxt = lambda: next(ks)
    H, I = HIDDEN, INPUT
    return {
        "weight_ih_l0": _uniform(nxt(), (4 * H, I), H),
        "weight_hh_l0": _uniform(nxt(), (4 * H, H), H),
        "bias_ih_l0":   _uniform(nxt(), (4 * H,), H),
        "bias_hh_l0":   _uniform(nxt(), (4 * H,), H),
        "weight_ih_l1": _uniform(nxt(), (4 * H, H), H),
        "weight_hh_l1": _uniform(nxt(), (4 * H, H), H),
        "bias_ih_l1":   _uniform(nxt(), (4 * H,), H),
        "bias_hh_l1":   _uniform(nxt(), (4 * H,), H),
        "linear_weight": _uniform(nxt(), (H, H), H),
        "linear_bias":   _uniform(nxt(), (H,), H),
    }


def pack_params(p):
    """One-time repack of ALL params into a single (SLAB_ROWS, 128) f32 slab."""
    H = HIDDEN
    wih0 = p["weight_ih_l0"].T                                    # (I, 4H)
    whh0 = p["weight_hh_l0"].T                                    # (H, 4H)
    wih1 = p["weight_ih_l1"].T                                    # (H, 4H)
    whh1 = p["weight_hh_l1"].T                                    # (H, 4H)
    # Block-diagonal copy of the Linear weight: applies the same (H,H) matmul
    # to all BAR slots of the lane-dense (B, BAR*H) feature slab in one push.
    wlin_blk = jnp.kron(jnp.eye(BAR, dtype=jnp.float32),
                        p["linear_weight"].T)                     # (BAR*H, BAR*H)
    # Biases pre-broadcast to BATCH rows (no in-kernel sublane broadcast).
    b0 = jnp.tile((p["bias_ih_l0"] + p["bias_hh_l0"])[None, :], (BATCH, 1))
    b1 = jnp.tile((p["bias_ih_l1"] + p["bias_hh_l1"])[None, :], (BATCH, 1))
    blin = jnp.tile(jnp.tile(p["linear_bias"], BAR)[None, :], (BATCH, 1))
    slab = jnp.concatenate([wih0, whh0, wih1, whh1, wlin_blk, b0, b1, blin],
                           axis=0).astype(jnp.float32)
    assert slab.shape == (_SLAB_ROWS, 4 * H)
    return slab


# --------------------------------- forward ------------------------------------
@jax.jit
def conductor_forward(z, slab):
    Bz = z.shape[0]
    feat_flat = pl.pallas_call(
        _conductor_kernel,
        out_shape=jax.ShapeDtypeStruct((Bz, BAR * HIDDEN), jnp.float32),
        in_specs=[_VMEM, _VMEM],
        out_specs=_VMEM,
        scratch_shapes=[pltpu.VMEM((Bz, BAR * HIDDEN), jnp.float32)],
    )(z, slab)
    return feat_flat.reshape(Bz, BAR, HIDDEN)


# ----------------------------- pure-JAX reference ------------------------------
def conductor_reference(z, p):
    H = HIDDEN
    h = [z, z]
    c = [z, z]
    feats = []
    for _ in range(BAR):
        x = z                                        # input reset to z each bar
        for l in range(NUM_LAYERS):
            wih = p[f"weight_ih_l{l}"]
            whh = p[f"weight_hh_l{l}"]
            b = p[f"bias_ih_l{l}"] + p[f"bias_hh_l{l}"]
            g = x @ wih.T + h[l] @ whh.T + b
            i = jax.nn.sigmoid(g[:, 0:H])
            f = jax.nn.sigmoid(g[:, H:2 * H])
            gg = jnp.tanh(g[:, 2 * H:3 * H])
            o = jax.nn.sigmoid(g[:, 3 * H:4 * H])
            c[l] = f * c[l] + i * gg
            h[l] = o * jnp.tanh(c[l])
            x = h[l]
        feats.append(x)
    feat = jnp.stack(feats, axis=1)                  # (B, BAR, H)
    return feat @ p["linear_weight"].T + p["linear_bias"]


# ------------------------------------ main -------------------------------------
if __name__ == "__main__":
    key = jax.random.PRNGKey(0)
    k_par, k_z = jax.random.split(key)

    params = make_torch_params(k_par)
    slab = pack_params(params)
    z = jax.random.normal(k_z, (BATCH, INPUT), jnp.float32)

    feat = conductor_forward(z, slab)
    jax.block_until_ready(feat)

    ref = conductor_reference(z, params)
    assert feat.shape == (BATCH, BAR, HIDDEN)
    max_err = float(jnp.max(jnp.abs(feat - ref)))
    assert max_err < 1e-4, f"mismatch vs reference: {max_err}"
    print("KERNEL_OK")
</pallas_src>

<mosaic_0001>
module attributes {stable_mosaic.version = 11 : i64} {
  func.func @_conductor_kernel(%arg0: memref<8x32xf32, #tpu.memory_space<vmem>>, %arg1: memref<280x128xf32, #tpu.memory_space<vmem>>, %arg2: memref<8x128xf32, #tpu.memory_space<vmem>>, %arg3: memref<8x128xf32, #tpu.memory_space<vmem>>) attributes {dimension_semantics = [], scalar_prefetch = 0 : i64, scratch_operands = 1 : i64, tpu.core_type = #tpu.core_type<tc>} {
    %c0 = arith.constant 0 : index
    %c0_0 = arith.constant 0 : index
    %0 = vector.load %arg0[%c0, %c0_0] : memref<8x32xf32, #tpu.memory_space<vmem>>, vector<8x32xf32>
    %c0_1 = arith.constant 0 : index
    %c0_2 = arith.constant 0 : index
    %1 = vector.load %arg1[%c0_1, %c0_2] : memref<280x128xf32, #tpu.memory_space<vmem>>, vector<32x128xf32>
    %c32 = arith.constant 32 : index
    %c0_3 = arith.constant 0 : index
    %2 = vector.load %arg1[%c32, %c0_3] : memref<280x128xf32, #tpu.memory_space<vmem>>, vector<32x128xf32>
    %c64 = arith.constant 64 : index
    %c0_4 = arith.constant 0 : index
    %3 = vector.load %arg1[%c64, %c0_4] : memref<280x128xf32, #tpu.memory_space<vmem>>, vector<32x128xf32>
    %c96 = arith.constant 96 : index
    %c0_5 = arith.constant 0 : index
    %4 = vector.load %arg1[%c96, %c0_5] : memref<280x128xf32, #tpu.memory_space<vmem>>, vector<32x128xf32>
    %c128 = arith.constant 128 : index
    %c0_6 = arith.constant 0 : index
    %5 = vector.load %arg1[%c128, %c0_6] : memref<280x128xf32, #tpu.memory_space<vmem>>, vector<128x128xf32>
    %c256 = arith.constant 256 : index
    %c0_7 = arith.constant 0 : index
    %6 = vector.load %arg1[%c256, %c0_7] : memref<280x128xf32, #tpu.memory_space<vmem>>, vector<8x128xf32>
    %c264 = arith.constant 264 : index
    %c0_8 = arith.constant 0 : index
    %7 = vector.load %arg1[%c264, %c0_8] : memref<280x128xf32, #tpu.memory_space<vmem>>, vector<8x128xf32>
    %c272 = arith.constant 272 : index
    %c0_9 = arith.constant 0 : index
    %8 = vector.load %arg1[%c272, %c0_9] : memref<280x128xf32, #tpu.memory_space<vmem>>, vector<8x128xf32>
    %cst = arith.constant dense<0.000000e+00> : vector<8x128xf32>
    %9 = tpu.matmul %0, %1, %cst {dimension_numbers = #tpu.dot_dimension_numbers<[1], [0], [0], [1], [0, 0, 1, 1], [], []>} : vector<8x32xf32>, vector<32x128xf32>, vector<8x128xf32> -> vector<8x128xf32>
    %10 = arith.addf %9, %6 : vector<8x128xf32>
    %cst_10 = arith.constant dense<0.000000e+00> : vector<8x128xf32>
    %11 = tpu.matmul %0, %4, %cst_10 {dimension_numbers = #tpu.dot_dimension_numbers<[1], [0], [0], [1], [0, 0, 1, 1], [], []>} : vector<8x32xf32>, vector<32x128xf32>, vector<8x128xf32> -> vector<8x128xf32>
    %cst_11 = arith.constant dense<0.000000e+00> : vector<8x128xf32>
    %12 = tpu.matmul %0, %2, %cst_11 {dimension_numbers = #tpu.dot_dimension_numbers<[1], [0], [0], [1], [0, 0, 1, 1], [], []>} : vector<8x32xf32>, vector<32x128xf32>, vector<8x128xf32> -> vector<8x128xf32>
    %13 = arith.addf %10, %12 : vector<8x128xf32>
    %14 = arith.negf %13 : vector<8x128xf32>
    %15 = math.exp %14 : vector<8x128xf32>
    %cst_12 = arith.constant 1.000000e+00 : f32
    %16 = vector.broadcast %cst_12 : f32 to vector<8x128xf32>
    %17 = arith.addf %16, %15 : vector<8x128xf32>
    %18 = arith.divf %16, %17 : vector<8x128xf32>
    %19 = math.tanh %13 : vector<8x128xf32>
    %20 = vector.extract_strided_slice %18 {offsets = [0, 0], sizes = [8, 32], strides = [1, 1]} : vector<8x128xf32> to vector<8x32xf32>
    %21 = vector.extract_strided_slice %18 {offsets = [0, 32], sizes = [8, 32], strides = [1, 1]} : vector<8x128xf32> to vector<8x32xf32>
    %22 = vector.extract_strided_slice %19 {offsets = [0, 64], sizes = [8, 32], strides = [1, 1]} : vector<8x128xf32> to vector<8x32xf32>
    %23 = vector.extract_strided_slice %18 {offsets = [0, 96], sizes = [8, 32], strides = [1, 1]} : vector<8x128xf32> to vector<8x32xf32>
    %24 = arith.mulf %21, %0 : vector<8x32xf32>
    %25 = arith.mulf %20, %22 : vector<8x32xf32>
    %26 = arith.addf %24, %25 : vector<8x32xf32>
    %27 = math.tanh %26 : vector<8x32xf32>
    %28 = arith.mulf %23, %27 : vector<8x32xf32>
    %cst_13 = arith.constant dense<0.000000e+00> : vector<8x128xf32>
    %29 = tpu.matmul %28, %3, %cst_13 {dimension_numbers = #tpu.dot_dimension_numbers<[1], [0], [0], [1], [0, 0, 1, 1], [], []>} : vector<8x32xf32>, vector<32x128xf32>, vector<8x128xf32> -> vector<8x128xf32>
    %30 = arith.addf %29, %11 : vector<8x128xf32>
    %31 = arith.addf %30, %7 : vector<8x128xf32>
    %32 = arith.negf %31 : vector<8x128xf32>
    %33 = math.exp %32 : vector<8x128xf32>
    %cst_14 = arith.constant 1.000000e+00 : f32
    %34 = vector.broadcast %cst_14 : f32 to vector<8x128xf32>
    %35 = arith.addf %34, %33 : vector<8x128xf32>
    %36 = arith.divf %34, %35 : vector<8x128xf32>
    %37 = math.tanh %31 : vector<8x128xf32>
    %38 = vector.extract_strided_slice %36 {offsets = [0, 0], sizes = [8, 32], strides = [1, 1]} : vector<8x128xf32> to vector<8x32xf32>
    %39 = vector.extract_strided_slice %36 {offsets = [0, 32], sizes = [8, 32], strides = [1, 1]} : vector<8x128xf32> to vector<8x32xf32>
    %40 = vector.extract_strided_slice %37 {offsets = [0, 64], sizes = [8, 32], strides = [1, 1]} : vector<8x128xf32> to vector<8x32xf32>
    %41 = vector.extract_strided_slice %36 {offsets = [0, 96], sizes = [8, 32], strides = [1, 1]} : vector<8x128xf32> to vector<8x32xf32>
    %42 = arith.mulf %39, %0 : vector<8x32xf32>
    %43 = arith.mulf %38, %40 : vector<8x32xf32>
    %44 = arith.addf %42, %43 : vector<8x32xf32>
    %45 = math.tanh %44 : vector<8x32xf32>
    %46 = arith.mulf %41, %45 : vector<8x32xf32>
    %c0_15 = arith.constant 0 : index
    %c0_16 = arith.constant 0 : index
    %47 = vector.load %arg3[%c0_15, %c0_16] : memref<8x128xf32, #tpu.memory_space<vmem>>, vector<8x32xf32>
    tpu.vector_store %arg3[%c0_15, %c0_16], %46 {strides = array<i32>} : memref<8x128xf32, #tpu.memory_space<vmem>>, vector<8x32xf32>,
    %cst_17 = arith.constant dense<0.000000e+00> : vector<8x128xf32>
    %48 = tpu.matmul %46, %4, %cst_17 {dimension_numbers = #tpu.dot_dimension_numbers<[1], [0], [0], [1], [0, 0, 1, 1], [], []>} : vector<8x32xf32>, vector<32x128xf32>, vector<8x128xf32> -> vector<8x128xf32>
    %cst_18 = arith.constant dense<0.000000e+00> : vector<8x128xf32>
    %49 = tpu.matmul %28, %2, %cst_18 {dimension_numbers = #tpu.dot_dimension_numbers<[1], [0], [0], [1], [0, 0, 1, 1], [], []>} : vector<8x32xf32>, vector<32x128xf32>, vector<8x128xf32> -> vector<8x128xf32>
    %50 = arith.addf %10, %49 : vector<8x128xf32>
    %51 = arith.negf %50 : vector<8x128xf32>
    %52 = math.exp %51 : vector<8x128xf32>
    %cst_19 = arith.constant 1.000000e+00 : f32
    %53 = vector.broadcast %cst_19 : f32 to vector<8x128xf32>
    %54 = arith.addf %53, %52 : vector<8x128xf32>
    %55 = arith.divf %53, %54 : vector<8x128xf32>
    %56 = math.tanh %50 : vector<8x128xf32>
    %57 = vector.extract_strided_slice %55 {offsets = [0, 0], sizes = [8, 32], strides = [1, 1]} : vector<8x128xf32> to vector<8x32xf32>
    %58 = vector.extract_strided_slice %55 {offsets = [0, 32], sizes = [8, 32], strides = [1, 1]} : vector<8x128xf32> to vector<8x32xf32>
    %59 = vector.extract_strided_slice %56 {offsets = [0, 64], sizes = [8, 32], strides = [1, 1]} : vector<8x128xf32> to vector<8x32xf32>
    %60 = vector.extract_strided_slice %55 {offsets = [0, 96], sizes = [8, 32], strides = [1, 1]} : vector<8x128xf32> to vector<8x32xf32>
    %61 = arith.mulf %58, %26 : vector<8x32xf32>
    %62 = arith.mulf %57, %59 : vector<8x32xf32>
    %63 = arith.addf %61, %62 : vector<8x32xf32>
    %64 = math.tanh %63 : vector<8x32xf32>
    %65 = arith.mulf %60, %64 : vector<8x32xf32>
    %cst_20 = arith.constant dense<0.000000e+00> : vector<8x128xf32>
    %66 = tpu.matmul %65, %3, %cst_20 {dimension_numbers = #tpu.dot_dimension_numbers<[1], [0], [0], [1], [0, 0, 1, 1], [], []>} : vector<8x32xf32>, vector<32x128xf32>, vector<8x128xf32> -> vector<8x128xf32>
    %67 = arith.addf %66, %48 : vector<8x128xf32>
    %68 = arith.addf %67, %7 : vector<8x128xf32>
    %69 = arith.negf %68 : vector<8x128xf32>
    %70 = math.exp %69 : vector<8x128xf32>
    %cst_21 = arith.constant 1.000000e+00 : f32
    %71 = vector.broadcast %cst_21 : f32 to vector<8x128xf32>
    %72 = arith.addf %71, %70 : vector<8x128xf32>
    %73 = arith.divf %71, %72 : vector<8x128xf32>
    %74 = math.tanh %68 : vector<8x128xf32>
    %75 = vector.extract_strided_slice %73 {offsets = [0, 0], sizes = [8, 32], strides = [1, 1]} : vector<8x128xf32> to vector<8x32xf32>
    %76 = vector.extract_strided_slice %73 {offsets = [0, 32], sizes = [8, 32], strides = [1, 1]} : vector<8x128xf32> to vector<8x32xf32>
    %77 = vector.extract_strided_slice %74 {offsets = [0, 64], sizes = [8, 32], strides = [1, 1]} : vector<8x128xf32> to vector<8x32xf32>
    %78 = vector.extract_strided_slice %73 {offsets = [0, 96], sizes = [8, 32], strides = [1, 1]} : vector<8x128xf32> to vector<8x32xf32>
    %79 = arith.mulf %76, %44 : vector<8x32xf32>
    %80 = arith.mulf %75, %77 : vector<8x32xf32>
    %81 = arith.addf %79, %80 : vector<8x32xf32>
    %82 = math.tanh %81 : vector<8x32xf32>
    %83 = arith.mulf %78, %82 : vector<8x32xf32>
    %c0_22 = arith.constant 0 : index
    %c32_23 = arith.constant 32 : index
    %84 = vector.load %arg3[%c0_22, %c32_23] : memref<8x128xf32, #tpu.memory_space<vmem>>, vector<8x32xf32>
    tpu.vector_store %arg3[%c0_22, %c32_23], %83 {strides = array<i32>} : memref<8x128xf32, #tpu.memory_space<vmem>>, vector<8x32xf32>,
    %cst_24 = arith.constant dense<0.000000e+00> : vector<8x128xf32>
    %85 = tpu.matmul %83, %4, %cst_24 {dimension_numbers = #tpu.dot_dimension_numbers<[1], [0], [0], [1], [0, 0, 1, 1], [], []>} : vector<8x32xf32>, vector<32x128xf32>, vector<8x128xf32> -> vector<8x128xf32>
    %cst_25 = arith.constant dense<0.000000e+00> : vector<8x128xf32>
    %86 = tpu.matmul %65, %2, %cst_25 {dimension_numbers = #tpu.dot_dimension_numbers<[1], [0], [0], [1], [0, 0, 1, 1], [], []>} : vector<8x32xf32>, vector<32x128xf32>, vector<8x128xf32> -> vector<8x128xf32>
    %87 = arith.addf %10, %86 : vector<8x128xf32>
    %88 = arith.negf %87 : vector<8x128xf32>
    %89 = math.exp %88 : vector<8x128xf32>
    %cst_26 = arith.constant 1.000000e+00 : f32
    %90 = vector.broadcast %cst_26 : f32 to vector<8x128xf32>
    %91 = arith.addf %90, %89 : vector<8x128xf32>
    %92 = arith.divf %90, %91 : vector<8x128xf32>
    %93 = math.tanh %87 : vector<8x128xf32>
    %94 = vector.extract_strided_slice %92 {offsets = [0, 0], sizes = [8, 32], strides = [1, 1]} : vector<8x128xf32> to vector<8x32xf32>
    %95 = vector.extract_strided_slice %92 {offsets = [0, 32], sizes = [8, 32], strides = [1, 1]} : vector<8x128xf32> to vector<8x32xf32>
    %96 = vector.extract_strided_slice %93 {offsets = [0, 64], sizes = [8, 32], strides = [1, 1]} : vector<8x128xf32> to vector<8x32xf32>
    %97 = vector.extract_strided_slice %92 {offsets = [0, 96], sizes = [8, 32], strides = [1, 1]} : vector<8x128xf32> to vector<8x32xf32>
    %98 = arith.mulf %95, %63 : vector<8x32xf32>
    %99 = arith.mulf %94, %96 : vector<8x32xf32>
    %100 = arith.addf %98, %99 : vector<8x32xf32>
    %101 = math.tanh %100 : vector<8x32xf32>
    %102 = arith.mulf %97, %101 : vector<8x32xf32>
    %cst_27 = arith.constant dense<0.000000e+00> : vector<8x128xf32>
    %103 = tpu.matmul %102, %3, %cst_27 {dimension_numbers = #tpu.dot_dimension_numbers<[1], [0], [0], [1], [0, 0, 1, 1], [], []>} : vector<8x32xf32>, vector<32x128xf32>, vector<8x128xf32> -> vector<8x128xf32>
    %104 = arith.addf %103, %85 : vector<8x128xf32>
    %105 = arith.addf %104, %7 : vector<8x128xf32>
    %106 = arith.negf %105 : vector<8x128xf32>
    %107 = math.exp %106 : vector<8x128xf32>
    %cst_28 = arith.constant 1.000000e+00 : f32
    %108 = vector.broadcast %cst_28 : f32 to vector<8x128xf32>
    %109 = arith.addf %108, %107 : vector<8x128xf32>
    %110 = arith.divf %108, %109 : vector<8x128xf32>
    %111 = math.tanh %105 : vector<8x128xf32>
    %112 = vector.extract_strided_slice %110 {offsets = [0, 0], sizes = [8, 32], strides = [1, 1]} : vector<8x128xf32> to vector<8x32xf32>
    %113 = vector.extract_strided_slice %110 {offsets = [0, 32], sizes = [8, 32], strides = [1, 1]} : vector<8x128xf32> to vector<8x32xf32>
    %114 = vector.extract_strided_slice %111 {offsets = [0, 64], sizes = [8, 32], strides = [1, 1]} : vector<8x128xf32> to vector<8x32xf32>
    %115 = vector.extract_strided_slice %110 {offsets = [0, 96], sizes = [8, 32], strides = [1, 1]} : vector<8x128xf32> to vector<8x32xf32>
    %116 = arith.mulf %113, %81 : vector<8x32xf32>
    %117 = arith.mulf %112, %114 : vector<8x32xf32>
    %118 = arith.addf %116, %117 : vector<8x32xf32>
    %119 = math.tanh %118 : vector<8x32xf32>
    %120 = arith.mulf %115, %119 : vector<8x32xf32>
    %c0_29 = arith.constant 0 : index
    %c64_30 = arith.constant 64 : index
    %121 = vector.load %arg3[%c0_29, %c64_30] : memref<8x128xf32, #tpu.memory_space<vmem>>, vector<8x32xf32>
    tpu.vector_store %arg3[%c0_29, %c64_30], %120 {strides = array<i32>} : memref<8x128xf32, #tpu.memory_space<vmem>>, vector<8x32xf32>,
    %cst_31 = arith.constant dense<0.000000e+00> : vector<8x128xf32>
    %122 = tpu.matmul %120, %4, %cst_31 {dimension_numbers = #tpu.dot_dimension_numbers<[1], [0], [0], [1], [0, 0, 1, 1], [], []>} : vector<8x32xf32>, vector<32x128xf32>, vector<8x128xf32> -> vector<8x128xf32>
    %cst_32 = arith.constant dense<0.000000e+00> : vector<8x128xf32>
    %123 = tpu.matmul %102, %2, %cst_32 {dimension_numbers = #tpu.dot_dimension_numbers<[1], [0], [0], [1], [0, 0, 1, 1], [], []>} : vector<8x32xf32>, vector<32x128xf32>, vector<8x128xf32> -> vector<8x128xf32>
    %124 = arith.addf %10, %123 : vector<8x128xf32>
    %125 = arith.negf %124 : vector<8x128xf32>
    %126 = math.exp %125 : vector<8x128xf32>
    %cst_33 = arith.constant 1.000000e+00 : f32
    %127 = vector.broadcast %cst_33 : f32 to vector<8x128xf32>
    %128 = arith.addf %127, %126 : vector<8x128xf32>
    %129 = arith.divf %127, %128 : vector<8x128xf32>
    %130 = math.tanh %124 : vector<8x128xf32>
    %131 = vector.extract_strided_slice %129 {offsets = [0, 0], sizes = [8, 32], strides = [1, 1]} : vector<8x128xf32> to vector<8x32xf32>
    %132 = vector.extract_strided_slice %129 {offsets = [0, 32], sizes = [8, 32], strides = [1, 1]} : vector<8x128xf32> to vector<8x32xf32>
    %133 = vector.extract_strided_slice %130 {offsets = [0, 64], sizes = [8, 32], strides = [1, 1]} : vector<8x128xf32> to vector<8x32xf32>
    %134 = vector.extract_strided_slice %129 {offsets = [0, 96], sizes = [8, 32], strides = [1, 1]} : vector<8x128xf32> to vector<8x32xf32>
    %135 = arith.mulf %132, %100 : vector<8x32xf32>
    %136 = arith.mulf %131, %133 : vector<8x32xf32>
    %137 = arith.addf %135, %136 : vector<8x32xf32>
    %138 = math.tanh %137 : vector<8x32xf32>
    %139 = arith.mulf %134, %138 : vector<8x32xf32>
    %cst_34 = arith.constant dense<0.000000e+00> : vector<8x128xf32>
    %140 = tpu.matmul %139, %3, %cst_34 {dimension_numbers = #tpu.dot_dimension_numbers<[1], [0], [0], [1], [0, 0, 1, 1], [], []>} : vector<8x32xf32>, vector<32x128xf32>, vector<8x128xf32> -> vector<8x128xf32>
    %141 = arith.addf %140, %122 : vector<8x128xf32>
    %142 = arith.addf %141, %7 : vector<8x128xf32>
    %143 = arith.negf %142 : vector<8x128xf32>
    %144 = math.exp %143 : vector<8x128xf32>
    %cst_35 = arith.constant 1.000000e+00 : f32
    %145 = vector.broadcast %cst_35 : f32 to vector<8x128xf32>
    %146 = arith.addf %145, %144 : vector<8x128xf32>
    %147 = arith.divf %145, %146 : vector<8x128xf32>
    %148 = math.tanh %142 : vector<8x128xf32>
    %149 = vector.extract_strided_slice %147 {offsets = [0, 0], sizes = [8, 32], strides = [1, 1]} : vector<8x128xf32> to vector<8x32xf32>
    %150 = vector.extract_strided_slice %147 {offsets = [0, 32], sizes = [8, 32], strides = [1, 1]} : vector<8x128xf32> to vector<8x32xf32>
    %151 = vector.extract_strided_slice %148 {offsets = [0, 64], sizes = [8, 32], strides = [1, 1]} : vector<8x128xf32> to vector<8x32xf32>
    %152 = vector.extract_strided_slice %147 {offsets = [0, 96], sizes = [8, 32], strides = [1, 1]} : vector<8x128xf32> to vector<8x32xf32>
    %153 = arith.mulf %150, %118 : vector<8x32xf32>
    %154 = arith.mulf %149, %151 : vector<8x32xf32>
    %155 = arith.addf %153, %154 : vector<8x32xf32>
    %156 = math.tanh %155 : vector<8x32xf32>
    %157 = arith.mulf %152, %156 : vector<8x32xf32>
    %c0_36 = arith.constant 0 : index
    %c96_37 = arith.constant 96 : index
    %158 = vector.load %arg3[%c0_36, %c96_37] : memref<8x128xf32, #tpu.memory_space<vmem>>, vector<8x32xf32>
    tpu.vector_store %arg3[%c0_36, %c96_37], %157 {strides = array<i32>} : memref<8x128xf32, #tpu.memory_space<vmem>>, vector<8x32xf32>,
    %c0_38 = arith.constant 0 : index
    %c0_39 = arith.constant 0 : index
    %159 = vector.load %arg3[%c0_38, %c0_39] : memref<8x128xf32, #tpu.memory_space<vmem>>, vector<8x128xf32>
    %cst_40 = arith.constant dense<0.000000e+00> : vector<8x128xf32>
    %160 = tpu.matmul %159, %5, %cst_40 {dimension_numbers = #tpu.dot_dimension_numbers<[1], [0], [0], [1], [0, 0, 1, 1], [], []>} : vector<8x128xf32>, vector<128x128xf32>, vector<8x128xf32> -> vector<8x128xf32>
    %161 = arith.addf %160, %8 : vector<8x128xf32>
    %c0_41 = arith.constant 0 : index
    %c0_42 = arith.constant 0 : index
    %162 = vector.load %arg2[%c0_41, %c0_42] : memref<8x128xf32, #tpu.memory_space<vmem>>, vector<8x128xf32>
    tpu.vector_store %arg2[%c0_41, %c0_42], %161 {strides = array<i32>} : memref<8x128xf32, #tpu.memory_space<vmem>>, vector<8x128xf32>,
    return
  }
}

</mosaic_0001>

<bundles_post_ra>
// kernel: conductor_forward.1
= control target key start
LH: loop header
LB: loop body
LE: loop exit
PB: predicated region body
PF: predicated region fallthrough
CT: control target
= control target key end

     0   :  { %7 = vsyncpa [#allocation4], 0  ;;  %s1066_s0 = inlined_call_operand.hbm [shape: f32[8,32], index: 0, kind: input, shape index: {}]   ;;  %s1067_s1 = inlined_call_operand.hbm [shape: f32[280,128], index: 1, kind: input, shape index: {}]   ;;  %s1068_s2 = inlined_call_operand.vmem [shape: f32[8,128], index: 2, kind: output, shape index: {}]  }
   0x1   :  { %s14_s11 = sshll.u32 %s1066_s0, 4  ;;  %s15_s11 = int_to_ptr.hbm [resolvable:$true] %s14_s11 }
   0x2   :  { %8 = vsyncpa [#allocation6], 0  ;;  %s869_s12 = smov [#allocation3]   ;;  %s24_s16 = sshll.u32 %s1067_s1, 4  ;;  %s25_s16 = int_to_ptr.hbm [resolvable:$true] %s24_s16 }
   0x3   :  { %s16_s13 = sshll.u32 %s869_s12, 4  ;;  %s870_s17 = smov [#allocation5]   ;;  %s17_s13 = int_to_ptr.vmem [resolvable:$true] %s16_s13 }
   0x4   :  { %19 = dma.hbm_to_vmem [thread:$0]  %s15_s11, 128, %s17_s13, [#allocation4]  }
   0x5   :  { %s26_s18 = sshll.u32 %s870_s17, 4  ;;  %s871_s19 = smov 128   ;;  %s27_s18 = int_to_ptr.vmem [resolvable:$true] %s26_s18 }
   0x6   :  { %s872_s20 = smov 8  }
   0x7   :  { %32 = dma.hbm_to_vmem [thread:$0]  %s25_s16, 4480, %s27_s18, [#allocation6], %s871_s19, %s871_s19, %s872_s20  }
   0x8   :  { %865 = dma.done.wait [#allocation4], 128  }
   0x9   :  { %866 = vsyncadd [#allocation4], 4294967168 }
   0xa   :  { %867 = dma.done.wait [#allocation6], 4480  }
   0xb   :  { %868 = vsyncadd [#allocation6], 4294962816  ;;  %v897_v0 = vld [vmem:[#allocation5 + $0x78] sm:$0xff]  ;;  %v899_v1 = vld [vmem:[#allocation5 + $0x70] sm:$0xff]  ;;  %vm77_vm0 = vcmask 261120   ;;  %s873_s0 = smov 64  }
   0xc   :  { %113 = vmatpush.msra.mxu2 %v897_v0  ;;  %v902_v2 = vld [vmem:[#allocation5 + $0x68] sm:$0xff]  ;;  %v45_v3 = vld [vmem:[#allocation5 + $0x18] sm:$0xff]  ;;  %v44_v4 = vld [vmem:[#allocation5 + $0x10] sm:$0xff]  ;;  %s874_s1 = smov 32   ;;  %s875_s21 = smov 96  }
   0xd   :  { %93 = vmatpush.msra.mxu0 %v45_v3  ;;  %v905_v5 = vld [vmem:[#allocation5 + $0x60] sm:$0xff]  ;;  %v43_v6 = vld [vmem:[#allocation5 + $0x8] sm:$0xff]  ;;  %v41_v7 = vld [vmem:[#allocation3] sm:$0xff] }
   0xe   :  { %114 = vmatpush.msra.mxu2 %v899_v1  ;;  %v908_v8 = vld [vmem:[#allocation5 + $0x38] sm:$0xff]  ;;  %v42_v9 = vld [vmem:[#allocation5] sm:$0xff]  ;;  %v912_v10 = vld [vmem:[#allocation5 + $0x30] sm:$0xff] }
   0xf   :  { %94 = vmatpush.msra.mxu0 %v44_v4  ;;  %v915_v11 = vld [vmem:[#allocation5 + $0x28] sm:$0xff]  ;;  %v920_v12 = vld [vmem:[#allocation5 + $0x20] sm:$0xff]  ;;  %v947_v40 = vld [vmem:[#allocation5 + $0x58] sm:$0xff] }
  0x10   :  { %115 = vmatpush.msra.mxu2 %v902_v2  ;;  %v74_v14 = vld [vmem:[#allocation5 + $0x100] sm:$0xff]  ;;  %v949_v41 = vld [vmem:[#allocation5 + $0x50] sm:$0xff]  ;;  %199 = vmatpush.msra.mxu3 %v947_v40  ;;  %v953_v42 = vld [vmem:[#allocation5 + $0x48] sm:$0xff] }
  0x11   :  { %95 = vmatpush.msra.mxu0 %v43_v6  ;;  %498 = vmatpush.msra.mxu1 %v947_v40  ;;  %v958_v43 = vld [vmem:[#allocation5 + $0x40] sm:$0xff]  ;;  %v986_v47 = vld [vmem:[#allocation5 + $0x108] sm:$0xff] }
  0x12   :  { %116 = vmatpush.msra.mxu2 %v905_v5  ;;  %200 = vmatpush.msra.mxu3 %v949_v41 }
  0x13   :  { %726 = vmatmul.msk.f32.vlgmr.msra.gmra.mxu2 %vm77_vm0, %v41_v7  ;;  %96 = vmatpush.msra.mxu0 %v42_v9 }
  0x14   :  { %133 = vmatpush.msrb.mxu2 %v908_v8  ;;  %725 = vmatmul.msk.f32.vlgmr.msra.gmra.mxu0 %vm77_vm0, %v41_v7 }
  0x15   :  { %264 = vmatpush.msrb.mxu0 %v897_v0  ;;  %499 = vmatpush.msra.mxu1 %v949_v41 }
  0x16   :  { %134 = vmatpush.msrb.mxu2 %v912_v10  ;;  %201 = vmatpush.msra.mxu3 %v953_v42 }
  0x17   :  { %265 = vmatpush.msrb.mxu0 %v899_v1  ;;  %500 = vmatpush.msra.mxu1 %v953_v42 }
  0x18   :  { %135 = vmatpush.msrb.mxu2 %v915_v11  ;;  %202 = vmatpush.msra.mxu3 %v958_v43 }
  0x19   :  { %266 = vmatpush.msrb.mxu0 %v902_v2  ;;  %501 = vmatpush.msra.mxu1 %v958_v43 }
  0x1a   :  { %136 = vmatpush.msrb.mxu2 %v920_v12  ;;  %284 = vmatpush.msrb.mxu3 %v908_v8 }
  0x1b   :  { %727 = vmatmul.msk.f32.vlgmr.msrb.gmra.mxu2 %vm77_vm0, %v41_v7  ;;  %267 = vmatpush.msrb.mxu0 %v905_v5 }
  0x1c   :  { %347 = vmatpush.msra.mxu2 %v947_v40  ;;  %285 = vmatpush.msrb.mxu3 %v912_v10 }
  0x1d   :  { %435 = vmatpush.msra.mxu0 %v908_v8 }
  0x1e   :  { %348 = vmatpush.msra.mxu2 %v949_v41  ;;  %286 = vmatpush.msrb.mxu3 %v915_v11 }
  0x1f   :  { %436 = vmatpush.msra.mxu0 %v912_v10 }
  0x20   :  { %349 = vmatpush.msra.mxu2 %v953_v42  ;;  %287 = vmatpush.msrb.mxu3 %v920_v12 }
  0x21   :  { %437 = vmatpush.msra.mxu0 %v915_v11 }
  0x22   :  { %350 = vmatpush.msra.mxu2 %v958_v43 }
  0x23   :  { %438 = vmatpush.msra.mxu0 %v920_v12 }
  0x24   :  { %566 = vmatpush.msrb.mxu2 %v897_v0 }
  0x26   :  { %567 = vmatpush.msrb.mxu2 %v899_v1 }
  0x28   :  { %568 = vmatpush.msrb.mxu2 %v902_v2 }
  0x2a   :  { %569 = vmatpush.msrb.mxu2 %v905_v5 }
  0x91   :  { %v98_v15 = vpop.f32.mrf.mxu0 }
  0x92   :  { %v934_v16 = vadd.f32 %v98_v15, %v74_v14 }
  0x96   :  { %v932_v13 = vpop.f32.mrf.mxu2 }
  0x9e   :  { %v138_v17 = vpop.f32.mrf.mxu2 }
  0x9f   :  { %v141_v18 = vadd.f32 %v138_v17, %v934_v16 }
  0xa1   :  { %753 = vtanh.f32 %v141_v18  ;;  %v728_v20 = vmul.f32 -1.442695, %v141_v18 }
  0xa3   :  { %755 = vpow2.f32 %v728_v20 }
  0xa7   :  { %v754_v19 = vpop.eup %753 }
  0xa8   :  { %167 = vrot.lane.b32.xlu0 %v754_v19, %s873_s0 }
  0xa9   :  { %v756_v21 = vpop.eup %755 }
  0xaa   :  { %v145_v22 = vadd.f32 1.0, %v756_v21 }
  0xac   :  { %757 = vrcp.f32 %v145_v22  ;;  %v157_v28 = vand.u32 2147483648, %v145_v22  ;;  %vm151_vm2 = vweird.f32 %v145_v22  ;;  %v155_v29 = vand.u32 2147483647, %v145_v22 }
  0xae   :  { %v158_v31 = vor.u32 1.1754944e-38, %v157_v28  ;;  %vm156_vm4 = vcmp.eq.f32.partialorder %v155_v29, 8.507059e+37 }
  0xb0   :  { %162 = vrot.lane.b32.xlu0 %v41_v7, %s874_s1 }
  0xb2   :  { %v758_v23 = vpop.eup %757 }
  0xb3   :  { %v147_v24 = vmul.f32 %v758_v23, %v145_v22  ;;  %vm152_vm1 = vweird.f32 %v758_v23 }
  0xb4   :  { %vm153_vm3 = vmor %vm151_vm2, %vm152_vm1 }
  0xb5   :  { %v148_v25 = vsub.f32 1.0, %v147_v24 }
  0xb7   :  { %v149_v26 = vmul.f32 %v758_v23, %v148_v25 }
  0xb9   :  { %v150_v27 = vadd.f32 %v758_v23, %v149_v26 }
  0xbb   :  { %v154_v30 = vsel %vm153_vm3, %v758_v23, %v150_v27 }
  0xbc   :  { %v159_v33 = vsel %vm156_vm4, %v158_v31, %v154_v30 }
 0x11a   :  { %v168_v32 = vpop.permute.xlu0 %167 }
 0x11b   :  { %v170_v34 = vmul.f32 %v168_v32, %v159_v33 }
 0x11d   :  { %172 = vrot.lane.b32.xlu1 %v170_v34, %s874_s1 }
 0x122   :  { %v940_v35 = vpop.permute.xlu0 %162 }
 0x123   :  { %v165_v36 = vmul.f32 %v940_v35, %v159_v33 }
 0x18f   :  { %v173_v37 = vpop.permute.xlu1 %172 }
 0x190   :  { %v943_v38 = vadd.f32 %v173_v37, %v165_v36 }
 0x192   :  { %759 = vtanh.f32 %v943_v38 }
 0x198   :  { %v760_v39 = vpop.eup %759 }
 0x199   :  { %178 = vrot.lane.b32.xlu1 %v760_v39, %s873_s0 }
 0x20b   :  { %v179_v44 = vpop.permute.xlu1 %178 }
 0x20c   :  { %v181_v45 = vmul.f32 %v179_v44, %v159_v33 }
 0x20e   :  { %183 = vrot.lane.b32.xlu2 %v181_v45, %s874_s1 }
 0x268   :  { %v184_v46 = vpop.permute.xlu2 %183 }
 0x269   :  { %729 = vmatmul.msk.f32.vlgmr.msra.gmra.mxu3 %vm77_vm0, %v184_v46 }
 0x26a   :  { %415 = vmatpush.msra.mxu3 %v897_v0 }
 0x26c   :  { %416 = vmatpush.msra.mxu3 %v899_v1 }
 0x26e   :  { %417 = vmatpush.msra.mxu3 %v902_v2 }
 0x270   :  { %418 = vmatpush.msra.mxu3 %v905_v5 }
 0x271   :  { %732 = vmatmul.msk.f32.vlgmr.msrb.gmra.mxu3 %vm77_vm0, %v184_v46 }
 0x272   :  { %586 = vmatpush.msrb.mxu3 %v908_v8 }
 0x274   :  { %587 = vmatpush.msrb.mxu3 %v912_v10 }
 0x276   :  { %588 = vmatpush.msrb.mxu3 %v915_v11 }
 0x278   :  { %589 = vmatpush.msrb.mxu3 %v920_v12 }
 0x2ec   :  { %v204_v48 = vpop.f32.mrf.mxu3 }
 0x2ed   :  { %v205_v49 = vadd.f32 %v204_v48, %v932_v13 }
 0x2ef   :  { %v207_v50 = vadd.f32 %v205_v49, %v986_v47 }
 0x2f1   :  { %761 = vtanh.f32 %v207_v50  ;;  %v730_v58 = vmul.f32 -1.442695, %v207_v50 }
 0x2f4   :  { %v289_v51 = vpop.f32.mrf.mxu3 }
 0x2f5   :  { %v292_v52 = vadd.f32 %v289_v51, %v934_v16 }
 0x2f7   :  { %v762_v53 = vpop.eup %761  ;;  %763 = vtanh.f32 %v292_v52  ;;  %v733_v55 = vmul.f32 -1.442695, %v292_v52 }
 0x2f8   :  { %230 = vrot.lane.b32.xlu0 %v762_v53, %s873_s0 }
 0x2f9   :  { %765 = vpow2.f32 %v733_v55 }
 0x2fd   :  { %v764_v54 = vpop.eup %763 }
 0x2fe   :  { %315 = vrot.lane.b32.xlu2 %v764_v54, %s873_s0 }
 0x2ff   :  { %v766_v56 = vpop.eup %765 }
 0x300   :  { %v296_v57 = vadd.f32 1.0, %v766_v56 }
 0x302   :  { %767 = vrcp.f32 %v296_v57  ;;  %v308_v2 = vand.u32 2147483648, %v296_v57  ;;  %vm302_vm6 = vweird.f32 %v296_v57  ;;  %v306_v3 = vand.u32 2147483647, %v296_v57 }
 0x303   :  { %769 = vpow2.f32 %v730_v58 }
 0x304   :  { %v309_v6 = vor.u32 1.1754944e-38, %v308_v2  ;;  %vm307_vm8 = vcmp.eq.f32.partialorder %v306_v3, 8.507059e+37 }
 0x308   :  { %v768_v59 = vpop.eup %767 }
 0x309   :  { %v298_v60 = vmul.f32 %v768_v59, %v296_v57  ;;  %v770_v61 = vpop.eup %769  ;;  %vm303_vm5 = vweird.f32 %v768_v59 }
 0x30a   :  { %v211_v63 = vadd.f32 1.0, %v770_v61  ;;  %vm304_vm7 = vmor %vm302_vm6, %vm303_vm5 }
 0x30b   :  { %v299_v62 = vsub.f32 1.0, %v298_v60 }
 0x30c   :  { %771 = vrcp.f32 %v211_v63  ;;  %v223_v14 = vand.u32 2147483648, %v211_v63  ;;  %vm217_vm10 = vweird.f32 %v211_v63  ;;  %v221_v15 = vand.u32 2147483647, %v211_v63 }
 0x30d   :  { %v300_v0 = vmul.f32 %v768_v59, %v299_v62 }
 0x30e   :  { %v224_v18 = vor.u32 1.1754944e-38, %v223_v14  ;;  %vm222_vm12 = vcmp.eq.f32.partialorder %v221_v15, 8.507059e+37 }
 0x30f   :  { %v301_v1 = vadd.f32 %v768_v59, %v300_v0 }
 0x311   :  { %v305_v5 = vsel %vm304_vm7, %v768_v59, %v301_v1 }
 0x312   :  { %v772_v4 = vpop.eup %771  ;;  %v310_v9 = vsel %vm307_vm8, %v309_v6, %v305_v5 }
 0x313   :  { %v213_v7 = vmul.f32 %v772_v4, %v211_v63  ;;  %vm218_vm9 = vweird.f32 %v772_v4  ;;  %v313_v25 = vmul.f32 %v310_v9, %v943_v38 }
 0x314   :  { %vm219_vm11 = vmor %vm217_vm10, %vm218_vm9 }
 0x315   :  { %v214_v11 = vsub.f32 1.0, %v213_v7 }
 0x317   :  { %v215_v12 = vmul.f32 %v772_v4, %v214_v11 }
 0x319   :  { %v216_v13 = vadd.f32 %v772_v4, %v215_v12 }
 0x31b   :  { %v220_v17 = vsel %vm219_vm11, %v772_v4, %v216_v13 }
 0x31c   :  { %v225_v20 = vsel %vm222_vm12, %v224_v18, %v220_v17 }
 0x31d   :  { %v228_v22 = vmul.f32 %v225_v20, %v940_v35 }
 0x358   :  { %v316_v8 = vpop.permute.xlu2 %315 }
 0x359   :  { %v318_v10 = vmul.f32 %v316_v8, %v310_v9 }
 0x35b   :  { %320 = vrot.lane.b32.xlu1 %v318_v10, %s874_s1 }
 0x36a   :  { %v231_v19 = vpop.permute.xlu0 %230 }
 0x36b   :  { %v233_v21 = vmul.f32 %v231_v19, %v225_v20 }
 0x36d   :  { %235 = vrot.lane.b32.xlu2 %v233_v21, %s874_s1 }
 0x3c7   :  { %v236_v23 = vpop.permute.xlu2 %235 }
 0x3c8   :  { %v996_v24 = vadd.f32 %v236_v23, %v228_v22 }
 0x3ca   :  { %773 = vtanh.f32 %v996_v24 }
 0x3cd   :  { %v321_v26 = vpop.permute.xlu1 %320 }
 0x3ce   :  { %v1000_v27 = vadd.f32 %v321_v26, %v313_v25 }
 0x3d0   :  { %v774_v28 = vpop.eup %773  ;;  %775 = vtanh.f32 %v1000_v27 }
 0x3d1   :  { %241 = vrot.lane.b32.xlu1 %v774_v28, %s873_s0 }
 0x3d6   :  { %v776_v29 = vpop.eup %775 }
 0x3d7   :  { %326 = vrot.lane.b32.xlu0 %v776_v29, %s873_s0 }
 0x443   :  { %v242_v30 = vpop.permute.xlu1 %241 }
 0x444   :  { %v244_v31 = vmul.f32 %v242_v30, %v225_v20 }
 0x446   :  { %246 = vrot.lane.b32.xlu0 %v244_v31, %s874_s1 }
 0x449   :  { %v327_v32 = vpop.permute.xlu0 %326 }
 0x44a   :  { %v329_v33 = vmul.f32 %v327_v32, %v310_v9 }
 0x44c   :  { %331 = vrot.lane.b32.xlu2 %v329_v33, %s874_s1 }
 0x4a6   :  { %v332_v34 = vpop.permute.xlu2 %331 }
 0x4a7   :  { %734 = vmatmul.msk.f32.vlgmr.msra.gmra.mxu2 %vm77_vm0, %v332_v34 }
 0x4b8   :  { %v247_v35 = vpop.permute.xlu0 %246 }
 0x4b9   :  { %249 = vst.msk [vmem:[#allocation2] sm:$0xff] %vm77_vm0, %v247_v35  ;;  %731 = vmatmul.msk.f32.vlgmr.msrb.gmra.mxu0 %vm77_vm0, %v247_v35 }
 0x4ba   :  { %649 = vmatpush.msrb.mxu0 %v947_v40 }
 0x4bc   :  { %650 = vmatpush.msrb.mxu0 %v949_v41 }
 0x4be   :  { %651 = vmatpush.msrb.mxu0 %v953_v42 }
 0x4c0   :  { %652 = vmatpush.msrb.mxu0 %v958_v43 }
 0x4c1   :  { %737 = vmatmul.msk.f32.vlgmr.msra.gmra.mxu0 %vm77_vm0, %v332_v34 }
 0x52a   :  { %v352_v36 = vpop.f32.mrf.mxu2 }
 0x536   :  { %v269_v37 = vpop.f32.mrf.mxu0 }
 0x537   :  { %v353_v38 = vadd.f32 %v352_v36, %v269_v37 }
 0x539   :  { %v355_v39 = vadd.f32 %v353_v38, %v986_v47 }
 0x53b   :  { %777 = vtanh.f32 %v355_v39  ;;  %v735_v48 = vmul.f32 -1.442695, %v355_v39 }
 0x53e   :  { %v440_v44 = vpop.f32.mrf.mxu0 }
 0x53f   :  { %v443_v45 = vadd.f32 %v440_v44, %v934_v16 }
 0x541   :  { %v778_v46 = vpop.eup %777  ;;  %779 = vtanh.f32 %v443_v45  ;;  %v738_v41 = vmul.f32 -1.442695, %v443_v45 }
 0x542   :  { %378 = vrot.lane.b32.xlu1 %v778_v46, %s873_s0 }
 0x543   :  { %781 = vpow2.f32 %v738_v41 }
 0x547   :  { %v780_v40 = vpop.eup %779 }
 0x548   :  { %466 = vrot.lane.b32.xlu2 %v780_v40, %s873_s0 }
 0x549   :  { %v782_v42 = vpop.eup %781 }
 0x54a   :  { %v447_v43 = vadd.f32 1.0, %v782_v42 }
 0x54c   :  { %783 = vrcp.f32 %v447_v43  ;;  %v459_v56 = vand.u32 2147483648, %v447_v43  ;;  %vm453_vm14 = vweird.f32 %v447_v43  ;;  %v457_v57 = vand.u32 2147483647, %v447_v43 }
 0x54d   :  { %785 = vpow2.f32 %v735_v48 }
 0x54e   :  { %v460_v60 = vor.u32 1.1754944e-38, %v459_v56  ;;  %vm458_vm1 = vcmp.eq.f32.partialorder %v457_v57, 8.507059e+37 }
 0x552   :  { %v784_v49 = vpop.eup %783 }
 0x553   :  { %v449_v50 = vmul.f32 %v784_v49, %v447_v43  ;;  %v786_v51 = vpop.eup %785  ;;  %vm454_vm13 = vweird.f32 %v784_v49 }
 0x554   :  { %v359_v53 = vadd.f32 1.0, %v786_v51  ;;  %vm455_vm15 = vmor %vm453_vm14, %vm454_vm13  ;;  %vm397_vm14 = vcmask 523520  }
 0x555   :  { %v450_v52 = vsub.f32 1.0, %v449_v50 }
 0x556   :  { %787 = vrcp.f32 %v359_v53  ;;  %v371_v4 = vand.u32 2147483648, %v359_v53  ;;  %vm365_vm3 = vweird.f32 %v359_v53  ;;  %v369_v5 = vand.u32 2147483647, %v359_v53 }
 0x557   :  { %v451_v54 = vmul.f32 %v784_v49, %v450_v52 }
 0x558   :  { %v372_v7 = vor.u32 1.1754944e-38, %v371_v4  ;;  %vm370_vm5 = vcmp.eq.f32.partialorder %v369_v5, 8.507059e+37 }
 0x559   :  { %v452_v55 = vadd.f32 %v784_v49, %v451_v54 }
 0x55b   :  { %v456_v59 = vsel %vm455_vm15, %v784_v49, %v452_v55 }
 0x55c   :  { %v788_v58 = vpop.eup %787  ;;  %v461_v63 = vsel %vm458_vm1, %v460_v60, %v456_v59 }
 0x55d   :  { %v361_v61 = vmul.f32 %v788_v58, %v359_v53  ;;  %vm366_vm2 = vweird.f32 %v788_v58  ;;  %v464_v11 = vmul.f32 %v461_v63, %v1000_v27 }
 0x55e   :  { %vm367_vm4 = vmor %vm365_vm3, %vm366_vm2  ;;  %vm548_vm3 = vcmask 785920  }
 0x55f   :  { %v362_v1 = vsub.f32 1.0, %v361_v61 }
 0x561   :  { %v363_v2 = vmul.f32 %v788_v58, %v362_v1 }
 0x563   :  { %v364_v3 = vadd.f32 %v788_v58, %v363_v2 }
 0x565   :  { %v368_v6 = vsel %vm367_vm4, %v788_v58, %v364_v3  ;;  %vm695_vm4 = vcmask 1048320  }
 0x566   :  { %v373_v9 = vsel %vm370_vm5, %v372_v7, %v368_v6 }
 0x567   :  { %v376_v15 = vmul.f32 %v373_v9, %v996_v24 }
 0x5a2   :  { %v467_v62 = vpop.permute.xlu2 %466 }
 0x5a3   :  { %v469_v0 = vmul.f32 %v467_v62, %v461_v63 }
 0x5a5   :  { %471 = vrot.lane.b32.xlu1 %v469_v0, %s874_s1 }
 0x5b4   :  { %v379_v8 = vpop.permute.xlu1 %378 }
 0x5b5   :  { %v381_v10 = vmul.f32 %v379_v8, %v373_v9 }
 0x5b7   :  { %383 = vrot.lane.b32.xlu0 %v381_v10, %s874_s1 }
 0x617   :  { %v472_v12 = vpop.permute.xlu1 %471 }
 0x618   :  { %v1022_v13 = vadd.f32 %v472_v12, %v464_v11 }
 0x61a   :  { %789 = vtanh.f32 %v1022_v13 }
 0x620   :  { %v790_v14 = vpop.eup %789 }
 0x621   :  { %477 = vrot.lane.b32.xlu0 %v790_v14, %s873_s0 }
 0x629   :  { %v384_v17 = vpop.permute.xlu0 %383 }
 0x62a   :  { %v1027_v18 = vadd.f32 %v384_v17, %v376_v15 }
 0x62c   :  { %791 = vtanh.f32 %v1027_v18 }
 0x632   :  { %v792_v19 = vpop.eup %791 }
 0x633   :  { %389 = vrot.lane.b32.xlu2 %v792_v19, %s873_s0 }
 0x68d   :  { %v390_v20 = vpop.permute.xlu2 %389 }
 0x68e   :  { %v1031_v21 = vmul.f32 %v390_v20, %v373_v9 }
 0x690   :  { %399 = vrot.lane.b32.xlu1 %v1031_v21, %s874_s1 }
 0x693   :  { %v478_v22 = vpop.permute.xlu0 %477 }
 0x694   :  { %v480_v23 = vmul.f32 %v478_v22, %v461_v63 }
 0x696   :  { %482 = vrot.lane.b32.xlu2 %v480_v23, %s874_s1 }
 0x6f0   :  { %v483_v25 = vpop.permute.xlu2 %482 }
 0x6f1   :  { %739 = vmatmul.msk.f32.vlgmr.msra.gmra.mxu1 %vm77_vm0, %v483_v25 }
 0x702   :  { %v400_v24 = vpop.permute.xlu1 %399 }
 0x703   :  { %736 = vmatmul.msk.f32.vlgmr.msra.gmra.mxu3 %vm77_vm0, %v400_v24 }
 0x70b   :  { %742 = vmatmul.msk.f32.vlgmr.msrb.gmra.mxu3 %vm77_vm0, %v483_v25 }
 0x76e   :  { %v503_v26 = vpop.f32.mrf.mxu1 }
 0x786   :  { %v420_v27 = vpop.f32.mrf.mxu3 }
 0x787   :  { %v504_v28 = vadd.f32 %v503_v26, %v420_v27 }
 0x789   :  { %v506_v29 = vadd.f32 %v504_v28, %v986_v47 }
 0x78b   :  { %793 = vtanh.f32 %v506_v29  ;;  %v740_v34 = vmul.f32 -1.442695, %v506_v29 }
 0x78e   :  { %v591_v30 = vpop.f32.mrf.mxu3 }
 0x78f   :  { %v594_v31 = vadd.f32 %v591_v30, %v934_v16 }
 0x791   :  { %v794_v32 = vpop.eup %793  ;;  %795 = vtanh.f32 %v594_v31  ;;  %v743_v35 = vmul.f32 -1.442695, %v594_v31 }
 0x792   :  { %529 = vrot.lane.b32.xlu0 %v794_v32, %s873_s0  ;;  %797 = vpow2.f32 %v740_v34 }
 0x793   :  { %799 = vpow2.f32 %v743_v35  ;;  %v73_v35 = vld [vmem:[#allocation5 + $0xf8] sm:$0xff] }
 0x794   :  { %698 = vmatpush.msrb.mxu1 %v73_v35 }
 0x797   :  { %v796_v33 = vpop.eup %795 }
 0x798   :  { %617 = vrot.lane.b32.xlu1 %v796_v33, %s873_s0  ;;  %v798_v36 = vpop.eup %797 }
 0x799   :  { %v510_v37 = vadd.f32 1.0, %v798_v36  ;;  %v800_v38 = vpop.eup %799  ;;  %v72_v36 = vld [vmem:[#allocation5 + $0xf0] sm:$0xff] }
 0x79a   :  { %v598_v39 = vadd.f32 1.0, %v800_v38  ;;  %699 = vmatpush.msrb.mxu1 %v72_v36  ;;  %v70_v38 = vld [vmem:[#allocation5 + $0xe0] sm:$0xff] }
 0x79b   :  { %801 = vrcp.f32 %v510_v37  ;;  %v522_v48 = vand.u32 2147483648, %v510_v37  ;;  %vm516_vm7 = vweird.f32 %v510_v37  ;;  %v520_v49 = vand.u32 2147483647, %v510_v37 }
 0x79c   :  { %803 = vrcp.f32 %v598_v39  ;;  %v610_v56 = vand.u32 2147483648, %v598_v39  ;;  %vm604_vm11 = vweird.f32 %v598_v39  ;;  %v608_v58 = vand.u32 2147483647, %v598_v39 }
 0x79d   :  { %v523_v52 = vor.u32 1.1754944e-38, %v522_v48  ;;  %vm521_vm9 = vcmp.eq.f32.partialorder %v520_v49, 8.507059e+37 }
 0x79e   :  { %v611_v60 = vor.u32 1.1754944e-38, %v610_v56  ;;  %vm609_vm13 = vcmp.eq.f32.partialorder %v608_v58, 8.507059e+37 }
 0x7a1   :  { %v802_v44 = vpop.eup %801 }
 0x7a2   :  { %v512_v45 = vmul.f32 %v802_v44, %v510_v37  ;;  %v804_v16 = vpop.eup %803  ;;  %vm517_vm6 = vweird.f32 %v802_v44  ;;  %v71_v37 = vld [vmem:[#allocation5 + $0xe8] sm:$0xff] }
 0x7a3   :  { %v600_v40 = vmul.f32 %v804_v16, %v598_v39  ;;  %vm518_vm8 = vmor %vm516_vm7, %vm517_vm6  ;;  %vm605_vm10 = vweird.f32 %v804_v16  ;;  %700 = vmatpush.msrb.mxu1 %v71_v37  ;;  %v69_v39 = vld [vmem:[#allocation5 + $0xd8] sm:$0xff] }
 0x7a4   :  { %v513_v46 = vsub.f32 1.0, %v512_v45  ;;  %vm606_vm12 = vmor %vm604_vm11, %vm605_vm10  ;;  %v67_v45 = vld [vmem:[#allocation5 + $0xc8] sm:$0xff] }
 0x7a5   :  { %v601_v42 = vsub.f32 1.0, %v600_v40  ;;  %701 = vmatpush.msrb.mxu1 %v70_v38  ;;  %v64_v40 = vld [vmem:[#allocation5 + $0xb0] sm:$0xff] }
 0x7a6   :  { %v514_v41 = vmul.f32 %v802_v44, %v513_v46  ;;  %v65_v46 = vld [vmem:[#allocation5 + $0xb8] sm:$0xff] }
 0x7a7   :  { %v602_v50 = vmul.f32 %v804_v16, %v601_v42  ;;  %702 = vmatpush.msrb.mxu1 %v69_v39 }
 0x7a8   :  { %v515_v43 = vadd.f32 %v802_v44, %v514_v41  ;;  %v63_v41 = vld [vmem:[#allocation5 + $0xa8] sm:$0xff] }
 0x7a9   :  { %v603_v53 = vadd.f32 %v804_v16, %v602_v50 }
 0x7aa   :  { %v519_v51 = vsel %vm518_vm8, %v802_v44, %v515_v43  ;;  %v68_v44 = vld [vmem:[#allocation5 + $0xd0] sm:$0xff] }
 0x7ab   :  { %v524_v55 = vsel %vm521_vm9, %v523_v52, %v519_v51  ;;  %v607_v59 = vsel %vm606_vm12, %v804_v16, %v603_v53  ;;  %703 = vmatpush.msrb.mxu1 %v68_v44  ;;  %v66_v16 = vld [vmem:[#allocation5 + $0xc0] sm:$0xff]  ;;  %v61_v52 = vld [vmem:[#allocation5 + $0x98] sm:$0xff]  ;;  %v60_v53 = vld [vmem:[#allocation5 + $0x90] sm:$0xff] }
 0x7ac   :  { %v612_v62 = vsel %vm609_vm13, %v611_v60, %v607_v59  ;;  %v527_v0 = vmul.f32 %v524_v55, %v1027_v18  ;;  %v62_v51 = vld [vmem:[#allocation5 + $0xa0] sm:$0xff]  ;;  %v76_v59 = vld [vmem:[#allocation5 + $0x110] sm:$0xff] }
 0x7ad   :  { %v615_v4 = vmul.f32 %v612_v62, %v1022_v13  ;;  %704 = vmatpush.msrb.mxu1 %v67_v45 }
 0x7af   :  { %705 = vmatpush.msrb.mxu1 %v66_v16 }
 0x7b1   :  { %706 = vmatpush.msrb.mxu1 %v65_v46 }
 0x7b3   :  { %707 = vmatpush.msrb.mxu1 %v64_v40 }
 0x7b5   :  { %708 = vmatpush.msrb.mxu1 %v63_v41 }
 0x7b7   :  { %709 = vmatpush.msrb.mxu1 %v62_v51 }
 0x7b9   :  { %710 = vmatpush.msrb.mxu1 %v61_v52 }
 0x7bb   :  { %711 = vmatpush.msrb.mxu1 %v60_v53 }
 0x804   :  { %v530_v54 = vpop.permute.xlu0 %529 }
 0x805   :  { %v532_v57 = vmul.f32 %v530_v54, %v524_v55  ;;  %v59_v54 = vld [vmem:[#allocation5 + $0x88] sm:$0xff] }
 0x806   :  { %712 = vmatpush.msrb.mxu1 %v59_v54 }
 0x807   :  { %534 = vrot.lane.b32.xlu2 %v532_v57, %s874_s1 }
 0x80a   :  { %v618_v61 = vpop.permute.xlu1 %617 }
 0x80b   :  { %v620_v63 = vmul.f32 %v618_v61, %v612_v62 }
 0x80d   :  { %622 = vrot.lane.b32.xlu0 %v620_v63, %s874_s1 }
 0x861   :  { %v535_v1 = vpop.permute.xlu2 %534 }
 0x862   :  { %v1046_v2 = vadd.f32 %v535_v1, %v527_v0 }
 0x864   :  { %805 = vtanh.f32 %v1046_v2 }
 0x86a   :  { %v806_v3 = vpop.eup %805 }
 0x86b   :  { %540 = vrot.lane.b32.xlu1 %v806_v3, %s873_s0 }
 0x87f   :  { %v623_v5 = vpop.permute.xlu0 %622 }
 0x880   :  { %v625_v6 = vadd.f32 %v623_v5, %v615_v4 }
 0x882   :  { %807 = vtanh.f32 %v625_v6 }
 0x888   :  { %v808_v7 = vpop.eup %807 }
 0x889   :  { %628 = vrot.lane.b32.xlu2 %v808_v7, %s873_s0 }
 0x8dd   :  { %v541_v8 = vpop.permute.xlu1 %540 }
 0x8de   :  { %v543_v9 = vmul.f32 %v541_v8, %v524_v55  ;;  %v58_v55 = vld [vmem:[#allocation5 + $0x80] sm:$0xff] }
 0x8df   :  { %713 = vmatpush.msrb.mxu1 %v58_v55 }
 0x8e0   :  { %550 = vrot.lane.b32.xlu0 %v543_v9, %s874_s1 }
 0x8e3   :  { %v629_v10 = vpop.permute.xlu2 %628 }
 0x8e4   :  { %v631_v11 = vmul.f32 %v629_v10, %v612_v62 }
 0x8e6   :  { %633 = vrot.lane.b32.xlu1 %v631_v11, %s874_s1 }
 0x8ee   :  { %394 = vrot.lane.b32.xlu1 %v1031_v21, %s873_s0 }
 0x952   :  { %v551_v12 = vpop.permute.xlu0 %550 }
 0x953   :  { %741 = vmatmul.msk.f32.vlgmr.msrb.gmra.mxu2 %vm77_vm0, %v551_v12 }
 0x958   :  { %v634_v13 = vpop.permute.xlu1 %633 }
 0x959   :  { %744 = vmatmul.msk.f32.vlgmr.msrb.gmra.mxu0 %vm77_vm0, %v634_v13 }
 0x960   :  { %v395_v14 = vpop.permute.xlu1 %394 }
 0x961   :  { %398 = vst.msk [vmem:[#allocation2] sm:$0xff] %vm397_vm14, %v395_v14 }
 0x9d6   :  { %v571_v15 = vpop.f32.mrf.mxu2  ;;  %v654_v17 = vpop.f32.mrf.mxu0 }
 0x9d7   :  { %v655_v18 = vadd.f32 %v654_v17, %v571_v15 }
 0x9d9   :  { %v657_v19 = vadd.f32 %v655_v18, %v986_v47 }
 0x9db   :  { %809 = vtanh.f32 %v657_v19  ;;  %v745_v22 = vmul.f32 -1.442695, %v657_v19 }
 0x9dd   :  { %811 = vpow2.f32 %v745_v22 }
 0x9e1   :  { %v810_v20 = vpop.eup %809 }
 0x9e2   :  { %680 = vrot.lane.b32.xlu2 %v810_v20, %s873_s0 }
 0x9e3   :  { %v812_v21 = vpop.eup %811 }
 0x9e4   :  { %v661_v23 = vadd.f32 1.0, %v812_v21 }
 0x9e6   :  { %813 = vrcp.f32 %v661_v23  ;;  %v673_v29 = vand.u32 2147483648, %v661_v23  ;;  %vm667_vm15 = vweird.f32 %v661_v23  ;;  %v671_v30 = vand.u32 2147483647, %v661_v23 }
 0x9e8   :  { %v674_v31 = vor.u32 1.1754944e-38, %v673_v29  ;;  %vm672_vm2 = vcmp.eq.f32.partialorder %v671_v30, 8.507059e+37 }
 0x9ec   :  { %v814_v25 = vpop.eup %813 }
 0x9ed   :  { %v663_v24 = vmul.f32 %v814_v25, %v661_v23  ;;  %vm668_vm0 = vweird.f32 %v814_v25 }
 0x9ee   :  { %vm669_vm1 = vmor %vm667_vm15, %vm668_vm0 }
 0x9ef   :  { %v664_v26 = vsub.f32 1.0, %v663_v24 }
 0x9f1   :  { %v665_v27 = vmul.f32 %v814_v25, %v664_v26 }
 0x9f3   :  { %v666_v28 = vadd.f32 %v814_v25, %v665_v27 }
 0x9f5   :  { %v670_v47 = vsel %vm669_vm1, %v814_v25, %v666_v28 }
 0x9f6   :  { %v675_v33 = vsel %vm672_vm2, %v674_v31, %v670_v47 }
 0x9f7   :  { %v678_v42 = vmul.f32 %v675_v33, %v1046_v2 }
 0xa3c   :  { %v681_v32 = vpop.permute.xlu2 %680 }
 0xa3d   :  { %v683_v34 = vmul.f32 %v681_v32, %v675_v33 }
 0xa3f   :  { %685 = vrot.lane.b32.xlu0 %v683_v34, %s874_s1 }
 0xa47   :  { %545 = vrot.lane.b32.xlu0 %v543_v9, %s875_s21 }
 0xab1   :  { %v686_v43 = vpop.permute.xlu0 %685 }
 0xab2   :  { %v688_v48 = vadd.f32 %v686_v43, %v678_v42 }
 0xab4   :  { %815 = vtanh.f32 %v688_v48 }
 0xab9   :  { %v546_v49 = vpop.permute.xlu0 %545 }
 0xaba   :  { %v816_v50 = vpop.eup %815  ;;  %549 = vst.msk [vmem:[#allocation2] sm:$0xff] %vm548_vm3, %v546_v49 }
 0xabb   :  { %691 = vrot.lane.b32.xlu2 %v816_v50, %s873_s0 }
 0xb15   :  { %v692_v56 = vpop.permute.xlu2 %691 }
 0xb16   :  { %v694_v57 = vmul.f32 %v692_v56, %v675_v33 }
 0xb18   :  { %696 = vst.msk [vmem:[#allocation2] sm:$0xff] %vm695_vm4, %v694_v57 }
 0xb1f   :  { %v697_v58 = vld [vmem:[#allocation2] sm:$0xff] }
 0xb20   :  { %714 = vmatmul.f32.vlgmr.msrb.gmra.mxu1 %v697_v58 }
 0xb9d   :  { %v715_v60 = vpop.f32.mrf.mxu1 }
 0xb9e   :  { %v716_v61 = vadd.f32 %v715_v60, %v76_v59 }
 0xba0   :  { %718 = vst [vmem:[%s1068_s2] sm:$0xff] %v716_v61 }
 0xba1   :  { %723 = vsyncpa [#allocation4], 1 }
 0xba2   :  { %724 = vsyncpa [#allocation6], 1 }

</bundles_post_ra>
